<compile_context>
chip_gen: v6e
topology: v6e:2x2x1
jax: 0.10.0
libtpu: 0.0.40
codegen_flags: <defaults>
</compile_context>

<pallas_src>
import functools

import jax
import jax.numpy as jnp
from jax.experimental import pallas as pl
from jax.experimental.pallas import tpu as pltpu


_DEF_TILE_M = 256   # A row tile / decoder tile edge
_DEF_TILE_K = 512   # A column (reduction) tile; must be a multiple of _DEF_TILE_M


def _round_up(x, m):
    return ((x + m - 1) // m) * m


def _vmem_cap_bytes():
    """Physical VMEM per core (guarded: falls back to the smallest gen, v7x 64 MiB)."""
    try:
        info = pltpu.get_tpu_info()
        return int(getattr(info, "vmem_capacity_bytes", 64 << 20))
    except Exception:
        return 64 << 20


def _compiler_params(dim_sem, block_bytes, scratch_bytes=0):
    """Size the scoped-VMEM limit from the (double-buffered) tile footprint."""
    cap = _vmem_cap_bytes()
    est = 2 * int(block_bytes) + int(scratch_bytes) + (8 << 20)   # x2 double buffering
    est = min(max(est, 16 << 20), (cap * 3) // 4)                 # leave compiler headroom
    return pltpu.CompilerParams(dimension_semantics=dim_sem,
                                vmem_limit_bytes=int(est))


# ---------------------------------------------------------------------------
# Kernels
# ---------------------------------------------------------------------------
def gcn_aggregate_kernel(a_ref, p_ref, b_ref, o_ref, acc_ref, *, apply_relu):
    """out_rows = act(A_rows @ P + b), K-tiled over A's columns with f32 accumulator."""
    k = pl.program_id(1)

    @pl.when(k == 0)
    def _():
        acc_ref[...] = jnp.zeros_like(acc_ref)

    acc_ref[...] += jnp.dot(a_ref[...], p_ref[...],
                            preferred_element_type=jnp.float32)

    @pl.when(k == pl.num_programs(1) - 1)
    def _():
        out = acc_ref[...] + b_ref[...]
        if apply_relu:
            out = jnp.maximum(out, 0.0)
        o_ref[...] = out.astype(o_ref.dtype)


def classifier_kernel(bw_ref, z_ref, wc_ref, bc_ref, o_ref, acc_ref):
    """logits = (batch_weights @ Z) @ Wc + bc, streaming the N reduction axis."""
    k = pl.program_id(0)

    @pl.when(k == 0)
    def _():
        acc_ref[...] = jnp.zeros_like(acc_ref)

    acc_ref[...] += jnp.dot(bw_ref[...], z_ref[...],
                            preferred_element_type=jnp.float32)

    @pl.when(k == pl.num_programs(0) - 1)
    def _():
        feats = acc_ref[...].astype(jnp.bfloat16)
        o_ref[...] = jnp.dot(feats, wc_ref[...],
                             preferred_element_type=jnp.float32) + bc_ref[...]


def decoder_kernel(zi_ref, zj_ref, o_ref):
    """recon[i_tile, j_tile] = sigmoid(Z_i @ Z_j^T), contracting emb_dim directly."""
    s = jax.lax.dot_general(
        zi_ref[...], zj_ref[...],
        dimension_numbers=(((1,), (1,)), ((), ())),
        preferred_element_type=jnp.float32)
    # TODO(synk): for training, return pre-sigmoid scores + BCE-with-logits loss to
    # drop the O(N^2) EUP sigmoid entirely.
    o_ref[...] = jax.nn.sigmoid(s).astype(o_ref.dtype)


# ---------------------------------------------------------------------------
# Wrapper
# ---------------------------------------------------------------------------
def _gcn_aggregate(a_bf, p, bias, n_pad, tm, tk, fout, apply_relu):
    grid = (n_pad // tm, n_pad // tk)
    blk_bytes = tm * tk * 2 + tk * fout * 2 + fout * 4 + tm * fout * 2
    return pl.pallas_call(
        functools.partial(gcn_aggregate_kernel, apply_relu=apply_relu),
        out_shape=jax.ShapeDtypeStruct((n_pad, fout), jnp.bfloat16),
        grid=grid,
        in_specs=[
            pl.BlockSpec((tm, tk), lambda i, k: (i, k)),     # A tile
            pl.BlockSpec((tk, fout), lambda i, k: (k, 0)),   # P slab (hoisted F @ W)
            pl.BlockSpec((1, fout), lambda i, k: (0, 0)),    # bias (f32)
        ],
        out_specs=pl.BlockSpec((tm, fout), lambda i, k: (i, 0)),
        scratch_shapes=[pltpu.VMEM((tm, fout), jnp.float32)],
        compiler_params=_compiler_params(("parallel", "arbitrary"), blk_bytes,
                                         scratch_bytes=tm * fout * 4),
    )(a_bf, p, bias)


@functools.partial(jax.jit, static_argnames=("tile_m", "tile_k"))
def joint_forward(a_norm, x, w1, b1, w2, b2, batch_weights, w_cls, b_cls,
                  tile_m=_DEF_TILE_M, tile_k=_DEF_TILE_K):
    assert tile_k % tile_m == 0
    n, f_in = x.shape
    hidden = w1.shape[1]
    emb = w2.shape[1]
    batch = batch_weights.shape[0]
    n_cls = w_cls.shape[1]

    # ---- tile / N-padding selection (blocks always divide the padded extent) ------
    if n <= tile_k:
        n_pad = _round_up(n, 128)
        tk = n_pad
        tm = tile_m if n_pad % tile_m == 0 else n_pad
    else:
        n_pad = _round_up(n, tile_k)
        tm, tk = tile_m, tile_k

    # ---- lane-dense feature padding (padded columns are exactly zero) -------------
    hid_p = _round_up(hidden, 128)
    emb_p = _round_up(emb, 128)
    cls_p = _round_up(n_cls, 128)

    a_bf = jnp.zeros((n_pad, n_pad), jnp.bfloat16).at[:n, :n].set(
        a_norm.astype(jnp.bfloat16))
    x_bf = jnp.zeros((n_pad, f_in), jnp.bfloat16).at[:n, :].set(
        x.astype(jnp.bfloat16))
    w1_p = jnp.zeros((f_in, hid_p), jnp.bfloat16).at[:, :hidden].set(
        w1.astype(jnp.bfloat16))
    b1_p = jnp.zeros((1, hid_p), jnp.float32).at[:, :hidden].set(
        b1.astype(jnp.float32).reshape(1, hidden))
    w2_p = jnp.zeros((hid_p, emb_p), jnp.bfloat16).at[:hidden, :emb].set(
        w2.astype(jnp.bfloat16))
    b2_p = jnp.zeros((1, emb_p), jnp.float32).at[:, :emb].set(
        b2.astype(jnp.float32).reshape(1, emb))
    wc_p = jnp.zeros((emb_p, cls_p), jnp.bfloat16).at[:emb, :n_cls].set(
        w_cls.astype(jnp.bfloat16))
    bc_p = jnp.zeros((1, cls_p), jnp.float32).at[:, :n_cls].set(
        b_cls.astype(jnp.float32).reshape(1, n_cls))
    bw_bf = jnp.zeros((batch, n_pad), jnp.bfloat16).at[:, :n].set(
        batch_weights.astype(jnp.bfloat16))

    # ---- encoder layer 1: H = relu(A @ (X @ W1) + b1) -----------------------------
    # Feature projection hoisted out of the Pallas kernel (tiny, O(N*f_in*hidden)).
    p1 = jnp.dot(x_bf, w1_p, preferred_element_type=jnp.float32).astype(jnp.bfloat16)
    h = _gcn_aggregate(a_bf, p1, b1_p, n_pad, tm, tk, hid_p, apply_relu=True)

    # ---- encoder layer 2: Z = A @ (H @ W2) + b2 ------------------------------------
    p2 = jnp.dot(h, w2_p, preferred_element_type=jnp.float32).astype(jnp.bfloat16)
    z = _gcn_aggregate(a_bf, p2, b2_p, n_pad, tm, tk, emb_p, apply_relu=False)

    # ---- classification head: logits = (bw @ Z) @ Wc + bc, streamed over N --------
    cls_blk = (batch * tk * 2 + tk * emb_p * 2 + emb_p * cls_p * 2
               + cls_p * 4 + batch * cls_p * 4)
    logits_pad = pl.pallas_call(
        classifier_kernel,
        out_shape=jax.ShapeDtypeStruct((batch, cls_p), jnp.float32),
        grid=(n_pad // tk,),
        in_specs=[
            pl.BlockSpec((batch, tk), lambda k: (0, k)),     # batch_weights slab
            pl.BlockSpec((tk, emb_p), lambda k: (k, 0)),     # Z slab
            pl.BlockSpec((emb_p, cls_p), lambda k: (0, 0)),  # Wc
            pl.BlockSpec((1, cls_p), lambda k: (0, 0)),      # bc (f32)
        ],
        out_specs=pl.BlockSpec((batch, cls_p), lambda k: (0, 0)),
        scratch_shapes=[pltpu.VMEM((batch, emb_p), jnp.float32)],
        compiler_params=_compiler_params(("arbitrary",), cls_blk,
                                         scratch_bytes=batch * emb_p * 4),
    )(bw_bf, z, wc_p, bc_p)
    class_logits = logits_pad[:, :n_cls]

    # ---- inner-product decoder: recon = sigmoid(Z @ Z.T), tiled over (i, j) --------
    dec_blk = 2 * tm * emb_p * 2 + tm * tm * 2
    recon_pad = pl.pallas_call(
        decoder_kernel,
        out_shape=jax.ShapeDtypeStruct((n_pad, n_pad), jnp.bfloat16),
        grid=(n_pad // tm, n_pad // tm),
        in_specs=[
            pl.BlockSpec((tm, emb_p), lambda i, j: (i, 0)),  # Z row block
            pl.BlockSpec((tm, emb_p), lambda i, j: (j, 0)),  # Z "column" block
        ],
        out_specs=pl.BlockSpec((tm, tm), lambda i, j: (i, j)),
        compiler_params=_compiler_params(("parallel", "parallel"), dec_blk),
    )(z, z)
    recon = recon_pad[:n, :n]

    return class_logits, recon


# ---------------------------------------------------------------------------
# Graph-setup glue + reference
# ---------------------------------------------------------------------------
def build_normalized_adjacency(edge_index, edge_attr, num_aps):
    """Scatter the edge list into a dense, symmetrically-normalized adjacency.
    # TODO(synk): irregular edge scatter is one-time graph preprocessing; done in
    # plain JAX, the Pallas kernels consume the resulting dense A_norm."""
    src, dst = edge_index[0], edge_index[1]
    a = jnp.zeros((num_aps, num_aps), jnp.float32)
    a = a.at[src, dst].add(edge_attr)
    a = a.at[dst, src].add(edge_attr)                 # symmetrize
    a = a + jnp.eye(num_aps, dtype=jnp.float32)       # self-loops
    deg = jnp.sum(a, axis=1)
    d_inv_sqrt = jax.lax.rsqrt(jnp.maximum(deg, 1e-12))
    return a * d_inv_sqrt[:, None] * d_inv_sqrt[None, :]


def reference_forward(a, x, w1, b1, w2, b2, bw, wc, bc):
    h = jnp.maximum(a @ (x @ w1) + b1, 0.0)
    z = a @ (h @ w2) + b2
    logits = (bw @ z) @ wc + bc
    recon = jax.nn.sigmoid(z @ z.T)
    return logits, recon


if __name__ == "__main__":
    # Small, deterministic shapes consistent with the forward pass.
    num_aps, in_feat, hidden, emb_dim = 16, 8, 32, 16
    batch, num_classes, num_edges = 4, 8, 40

    key = jax.random.PRNGKey(0)
    ks = jax.random.split(key, 10)

    # graph
    x = jax.random.normal(ks[0], (num_aps, in_feat), jnp.float32)
    edge_index = jax.random.randint(ks[1], (2, num_edges), 0, num_aps)
    edge_attr = jax.random.uniform(ks[2], (num_edges,), jnp.float32)
    a_norm = build_normalized_adjacency(edge_index, edge_attr, num_aps)

    # parameters (deterministic init)
    w1 = jax.random.normal(ks[3], (in_feat, hidden), jnp.float32) * (1.0 / jnp.sqrt(in_feat))
    b1 = jnp.zeros((1, hidden), jnp.float32)
    w2 = jax.random.normal(ks[4], (hidden, emb_dim), jnp.float32) * (1.0 / jnp.sqrt(hidden))
    b2 = jnp.zeros((1, emb_dim), jnp.float32)
    w_cls = jax.random.normal(ks[5], (emb_dim, num_classes), jnp.float32) * (1.0 / jnp.sqrt(emb_dim))
    b_cls = jnp.zeros((1, num_classes), jnp.float32)

    # batch_weights: [batch_size, num_aps]
    batch_weights = jax.random.uniform(ks[6], (batch, num_aps), jnp.float32)

    class_logits, recon_A = joint_forward(
        a_norm, x, w1, b1, w2, b2, batch_weights, w_cls, b_cls)
    jax.block_until_ready((class_logits, recon_A))

    assert class_logits.shape == (batch, num_classes)
    assert recon_A.shape == (num_aps, num_aps)

    # numerical check vs. f32 reference (bf16 matmul operands -> loose tolerance)
    ref_logits, ref_recon = reference_forward(
        a_norm, x, w1, b1, w2, b2, batch_weights, w_cls, b_cls)
    assert float(jnp.max(jnp.abs(class_logits - ref_logits))) < 0.3
    assert float(jnp.max(jnp.abs(recon_A.astype(jnp.float32) - ref_recon))) < 0.1

    print("KERNEL_OK")
</pallas_src>

<mosaic_0001>
module attributes {stable_mosaic.version = 11 : i64} {
  func.func @gcn_aggregate_kernel(%arg0: i32, %arg1: i32, %arg2: memref<128x128xbf16, #tpu.memory_space<vmem>>, %arg3: memref<128x128xbf16, #tpu.memory_space<vmem>>, %arg4: memref<1x128xf32, #tpu.memory_space<vmem>>, %arg5: memref<128x128xbf16, #tpu.memory_space<vmem>>, %arg6: memref<128x128xf32, #tpu.memory_space<vmem>>) attributes {dimension_semantics = [#tpu.dimension_semantics<parallel>, #tpu.dimension_semantics<arbitrary>], iteration_bounds = array<i64: 1, 1>, scalar_prefetch = 0 : i64, scratch_operands = 1 : i64, tpu.core_type = #tpu.core_type<tc>, window_params = [{transform_indices = @transform_0, window_bounds = array<i64: 128, 128>}, {transform_indices = @transform_1, window_bounds = array<i64: 128, 128>}, {pipeline_mode = #tpu.pipeline_mode<synchronous>, transform_indices = @transform_2, window_bounds = array<i64: 1, 128>}, {transform_indices = @transform_3, window_bounds = array<i64: 128, 128>}]} {
    %c0_i32 = arith.constant 0 : i32
    %0 = arith.cmpi eq, %arg1, %c0_i32 : i32
    %1 = arith.extui %0 : i1 to i32
    %c0_i32_0 = arith.constant 0 : i32
    %2 = arith.cmpi ne, %1, %c0_i32_0 : i32
    scf.if %2 {
      %cst_10 = arith.constant 0.000000e+00 : f32
      %12 = vector.broadcast %cst_10 : f32 to vector<128x128xf32>
      %c0_11 = arith.constant 0 : index
      %c0_12 = arith.constant 0 : index
      %13 = vector.load %arg6[%c0_11, %c0_12] : memref<128x128xf32, #tpu.memory_space<vmem>>, vector<128x128xf32>
      tpu.vector_store %arg6[%c0_11, %c0_12], %12 {strides = array<i32>} : memref<128x128xf32, #tpu.memory_space<vmem>>, vector<128x128xf32>,
    } else {
    }
    %c0 = arith.constant 0 : index
    %c0_1 = arith.constant 0 : index
    %3 = vector.load %arg6[%c0, %c0_1] : memref<128x128xf32, #tpu.memory_space<vmem>>, vector<128x128xf32>
    %c0_2 = arith.constant 0 : index
    %c0_3 = arith.constant 0 : index
    %4 = vector.load %arg2[%c0_2, %c0_3] : memref<128x128xbf16, #tpu.memory_space<vmem>>, vector<128x128xbf16>
    %c0_4 = arith.constant 0 : index
    %c0_5 = arith.constant 0 : index
    %5 = vector.load %arg3[%c0_4, %c0_5] : memref<128x128xbf16, #tpu.memory_space<vmem>>, vector<128x128xbf16>
    %cst = arith.constant dense<0.000000e+00> : vector<128x128xf32>
    %6 = tpu.matmul %4, %5, %cst {dimension_numbers = #tpu.dot_dimension_numbers<[1], [0], [0], [1], [0, 0, 1, 1], [], []>} : vector<128x128xbf16>, vector<128x128xbf16>, vector<128x128xf32> -> vector<128x128xf32>
    %7 = arith.addf %3, %6 : vector<128x128xf32>
    %c0_6 = arith.constant 0 : index
    %c0_7 = arith.constant 0 : index
    %8 = vector.load %arg6[%c0_6, %c0_7] : memref<128x128xf32, #tpu.memory_space<vmem>>, vector<128x128xf32>
    tpu.vector_store %arg6[%c0_6, %c0_7], %7 {strides = array<i32>} : memref<128x128xf32, #tpu.memory_space<vmem>>, vector<128x128xf32>,
    %c0_i32_8 = arith.constant 0 : i32
    %9 = arith.cmpi eq, %arg1, %c0_i32_8 : i32
    %10 = arith.extui %9 : i1 to i32
    %c0_i32_9 = arith.constant 0 : i32
    %11 = arith.cmpi ne, %10, %c0_i32_9 : i32
    scf.if %11 {
      %c0_10 = arith.constant 0 : index
      %c0_11 = arith.constant 0 : index
      %12 = vector.load %arg6[%c0_10, %c0_11] : memref<128x128xf32, #tpu.memory_space<vmem>>, vector<128x128xf32>
      %c0_12 = arith.constant 0 : index
      %c0_13 = arith.constant 0 : index
      %13 = vector.load %arg4[%c0_12, %c0_13] : memref<1x128xf32, #tpu.memory_space<vmem>>, vector<1x128xf32>
      %14 = vector.broadcast %13 : vector<1x128xf32> to vector<128x128xf32>
      %15 = arith.addf %12, %14 : vector<128x128xf32>
      %cst_14 = arith.constant 0.000000e+00 : f32
      %16 = vector.broadcast %cst_14 : f32 to vector<128x128xf32>
      %17 = arith.maximumf %15, %16 : vector<128x128xf32>
      %18 = arith.truncf %17 : vector<128x128xf32> to vector<128x128xbf16>
      %c0_15 = arith.constant 0 : index
      %c0_16 = arith.constant 0 : index
      %19 = vector.load %arg5[%c0_15, %c0_16] : memref<128x128xbf16, #tpu.memory_space<vmem>>, vector<128x128xbf16>
      tpu.vector_store %arg5[%c0_15, %c0_16], %18 {strides = array<i32>} : memref<128x128xbf16, #tpu.memory_space<vmem>>, vector<128x128xbf16>,
    } else {
    }
    return
  }
  func.func @transform_0(%arg0: i32, %arg1: i32) -> (i32, i32) {
    %c0_i32 = arith.constant 0 : i32
    return %arg0, %arg1 : i32, i32
  }
  func.func @transform_1(%arg0: i32, %arg1: i32) -> (i32, i32) {
    %c0_i32 = arith.constant 0 : i32
    %c0_i32_0 = arith.constant 0 : i32
    return %arg1, %c0_i32 : i32, i32
  }
  func.func @transform_2(%arg0: i32, %arg1: i32) -> (i32, i32) {
    %c0_i32 = arith.constant 0 : i32
    %c0_i32_0 = arith.constant 0 : i32
    %c0_i32_1 = arith.constant 0 : i32
    return %c0_i32, %c0_i32_0 : i32, i32
  }
  func.func @transform_3(%arg0: i32, %arg1: i32) -> (i32, i32) {
    %c0_i32 = arith.constant 0 : i32
    %c0_i32_0 = arith.constant 0 : i32
    return %arg0, %c0_i32 : i32, i32
  }
}

module attributes {stable_mosaic.version = 11 : i64} {
  func.func @gcn_aggregate_kernel(%arg0: i32, %arg1: i32, %arg2: memref<128x128xbf16, #tpu.memory_space<vmem>>, %arg3: memref<128x128xbf16, #tpu.memory_space<vmem>>, %arg4: memref<1x128xf32, #tpu.memory_space<vmem>>, %arg5: memref<128x128xbf16, #tpu.memory_space<vmem>>, %arg6: memref<128x128xf32, #tpu.memory_space<vmem>>) attributes {dimension_semantics = [#tpu.dimension_semantics<parallel>, #tpu.dimension_semantics<arbitrary>], iteration_bounds = array<i64: 1, 1>, scalar_prefetch = 0 : i64, scratch_operands = 1 : i64, tpu.core_type = #tpu.core_type<tc>, window_params = [{transform_indices = @transform_0, window_bounds = array<i64: 128, 128>}, {transform_indices = @transform_1, window_bounds = array<i64: 128, 128>}, {pipeline_mode = #tpu.pipeline_mode<synchronous>, transform_indices = @transform_2, window_bounds = array<i64: 1, 128>}, {transform_indices = @transform_3, window_bounds = array<i64: 128, 128>}]} {
    %c0_i32 = arith.constant 0 : i32
    %0 = arith.cmpi eq, %arg1, %c0_i32 : i32
    %1 = arith.extui %0 : i1 to i32
    %c0_i32_0 = arith.constant 0 : i32
    %2 = arith.cmpi ne, %1, %c0_i32_0 : i32
    scf.if %2 {
      %cst_10 = arith.constant 0.000000e+00 : f32
      %12 = vector.broadcast %cst_10 : f32 to vector<128x128xf32>
      %c0_11 = arith.constant 0 : index
      %c0_12 = arith.constant 0 : index
      %13 = vector.load %arg6[%c0_11, %c0_12] : memref<128x128xf32, #tpu.memory_space<vmem>>, vector<128x128xf32>
      tpu.vector_store %arg6[%c0_11, %c0_12], %12 {strides = array<i32>} : memref<128x128xf32, #tpu.memory_space<vmem>>, vector<128x128xf32>,
    } else {
    }
    %c0 = arith.constant 0 : index
    %c0_1 = arith.constant 0 : index
    %3 = vector.load %arg6[%c0, %c0_1] : memref<128x128xf32, #tpu.memory_space<vmem>>, vector<128x128xf32>
    %c0_2 = arith.constant 0 : index
    %c0_3 = arith.constant 0 : index
    %4 = vector.load %arg2[%c0_2, %c0_3] : memref<128x128xbf16, #tpu.memory_space<vmem>>, vector<128x128xbf16>
    %c0_4 = arith.constant 0 : index
    %c0_5 = arith.constant 0 : index
    %5 = vector.load %arg3[%c0_4, %c0_5] : memref<128x128xbf16, #tpu.memory_space<vmem>>, vector<128x128xbf16>
    %cst = arith.constant dense<0.000000e+00> : vector<128x128xf32>
    %6 = tpu.matmul %4, %5, %cst {dimension_numbers = #tpu.dot_dimension_numbers<[1], [0], [0], [1], [0, 0, 1, 1], [], []>} : vector<128x128xbf16>, vector<128x128xbf16>, vector<128x128xf32> -> vector<128x128xf32>
    %7 = arith.addf %3, %6 : vector<128x128xf32>
    %c0_6 = arith.constant 0 : index
    %c0_7 = arith.constant 0 : index
    %8 = vector.load %arg6[%c0_6, %c0_7] : memref<128x128xf32, #tpu.memory_space<vmem>>, vector<128x128xf32>
    tpu.vector_store %arg6[%c0_6, %c0_7], %7 {strides = array<i32>} : memref<128x128xf32, #tpu.memory_space<vmem>>, vector<128x128xf32>,
    %c0_i32_8 = arith.constant 0 : i32
    %9 = arith.cmpi eq, %arg1, %c0_i32_8 : i32
    %10 = arith.extui %9 : i1 to i32
    %c0_i32_9 = arith.constant 0 : i32
    %11 = arith.cmpi ne, %10, %c0_i32_9 : i32
    scf.if %11 {
      %c0_10 = arith.constant 0 : index
      %c0_11 = arith.constant 0 : index
      %12 = vector.load %arg6[%c0_10, %c0_11] : memref<128x128xf32, #tpu.memory_space<vmem>>, vector<128x128xf32>
      %c0_12 = arith.constant 0 : index
      %c0_13 = arith.constant 0 : index
      %13 = vector.load %arg4[%c0_12, %c0_13] : memref<1x128xf32, #tpu.memory_space<vmem>>, vector<1x128xf32>
      %14 = vector.broadcast %13 : vector<1x128xf32> to vector<128x128xf32>
      %15 = arith.addf %12, %14 : vector<128x128xf32>
      %16 = arith.truncf %15 : vector<128x128xf32> to vector<128x128xbf16>
      %c0_14 = arith.constant 0 : index
      %c0_15 = arith.constant 0 : index
      %17 = vector.load %arg5[%c0_14, %c0_15] : memref<128x128xbf16, #tpu.memory_space<vmem>>, vector<128x128xbf16>
      tpu.vector_store %arg5[%c0_14, %c0_15], %16 {strides = array<i32>} : memref<128x128xbf16, #tpu.memory_space<vmem>>, vector<128x128xbf16>,
    } else {
    }
    return
  }
  func.func @transform_0(%arg0: i32, %arg1: i32) -> (i32, i32) {
    %c0_i32 = arith.constant 0 : i32
    return %arg0, %arg1 : i32, i32
  }
  func.func @transform_1(%arg0: i32, %arg1: i32) -> (i32, i32) {
    %c0_i32 = arith.constant 0 : i32
    %c0_i32_0 = arith.constant 0 : i32
    return %arg1, %c0_i32 : i32, i32
  }
  func.func @transform_2(%arg0: i32, %arg1: i32) -> (i32, i32) {
    %c0_i32 = arith.constant 0 : i32
    %c0_i32_0 = arith.constant 0 : i32
    %c0_i32_1 = arith.constant 0 : i32
    return %c0_i32, %c0_i32_0 : i32, i32
  }
  func.func @transform_3(%arg0: i32, %arg1: i32) -> (i32, i32) {
    %c0_i32 = arith.constant 0 : i32
    %c0_i32_0 = arith.constant 0 : i32
    return %arg0, %c0_i32 : i32, i32
  }
}

module attributes {stable_mosaic.version = 11 : i64} {
  func.func @classifier_kernel(%arg0: i32, %arg1: memref<4x128xbf16, #tpu.memory_space<vmem>>, %arg2: memref<128x128xbf16, #tpu.memory_space<vmem>>, %arg3: memref<128x128xbf16, #tpu.memory_space<vmem>>, %arg4: memref<1x128xf32, #tpu.memory_space<vmem>>, %arg5: memref<4x128xf32, #tpu.memory_space<vmem>>, %arg6: memref<4x128xf32, #tpu.memory_space<vmem>>) attributes {dimension_semantics = [#tpu.dimension_semantics<arbitrary>], iteration_bounds = array<i64: 1>, scalar_prefetch = 0 : i64, scratch_operands = 1 : i64, tpu.core_type = #tpu.core_type<tc>, window_params = [{transform_indices = @transform_0, window_bounds = array<i64: 4, 128>}, {transform_indices = @transform_1, window_bounds = array<i64: 128, 128>}, {pipeline_mode = #tpu.pipeline_mode<synchronous>, transform_indices = @transform_2, window_bounds = array<i64: 128, 128>}, {pipeline_mode = #tpu.pipeline_mode<synchronous>, transform_indices = @transform_3, window_bounds = array<i64: 1, 128>}, {pipeline_mode = #tpu.pipeline_mode<synchronous>, transform_indices = @transform_4, window_bounds = array<i64: 4, 128>}]} {
    %c0_i32 = arith.constant 0 : i32
    %0 = arith.cmpi eq, %arg0, %c0_i32 : i32
    %1 = arith.extui %0 : i1 to i32
    %c0_i32_0 = arith.constant 0 : i32
    %2 = arith.cmpi ne, %1, %c0_i32_0 : i32
    scf.if %2 {
      %cst_10 = arith.constant 0.000000e+00 : f32
      %12 = vector.broadcast %cst_10 : f32 to vector<4x128xf32>
      %c0_11 = arith.constant 0 : index
      %c0_12 = arith.constant 0 : index
      %13 = vector.load %arg6[%c0_11, %c0_12] : memref<4x128xf32, #tpu.memory_space<vmem>>, vector<4x128xf32>
      tpu.vector_store %arg6[%c0_11, %c0_12], %12 {strides = array<i32>} : memref<4x128xf32, #tpu.memory_space<vmem>>, vector<4x128xf32>,
    } else {
    }
    %c0 = arith.constant 0 : index
    %c0_1 = arith.constant 0 : index
    %3 = vector.load %arg6[%c0, %c0_1] : memref<4x128xf32, #tpu.memory_space<vmem>>, vector<4x128xf32>
    %c0_2 = arith.constant 0 : index
    %c0_3 = arith.constant 0 : index
    %4 = vector.load %arg1[%c0_2, %c0_3] : memref<4x128xbf16, #tpu.memory_space<vmem>>, vector<4x128xbf16>
    %c0_4 = arith.constant 0 : index
    %c0_5 = arith.constant 0 : index
    %5 = vector.load %arg2[%c0_4, %c0_5] : memref<128x128xbf16, #tpu.memory_space<vmem>>, vector<128x128xbf16>
    %cst = arith.constant dense<0.000000e+00> : vector<4x128xf32>
    %6 = tpu.matmul %4, %5, %cst {dimension_numbers = #tpu.dot_dimension_numbers<[1], [0], [0], [1], [0, 0, 1, 1], [], []>} : vector<4x128xbf16>, vector<128x128xbf16>, vector<4x128xf32> -> vector<4x128xf32>
    %7 = arith.addf %3, %6 : vector<4x128xf32>
    %c0_6 = arith.constant 0 : index
    %c0_7 = arith.constant 0 : index
    %8 = vector.load %arg6[%c0_6, %c0_7] : memref<4x128xf32, #tpu.memory_space<vmem>>, vector<4x128xf32>
    tpu.vector_store %arg6[%c0_6, %c0_7], %7 {strides = array<i32>} : memref<4x128xf32, #tpu.memory_space<vmem>>, vector<4x128xf32>,
    %c0_i32_8 = arith.constant 0 : i32
    %9 = arith.cmpi eq, %arg0, %c0_i32_8 : i32
    %10 = arith.extui %9 : i1 to i32
    %c0_i32_9 = arith.constant 0 : i32
    %11 = arith.cmpi ne, %10, %c0_i32_9 : i32
    scf.if %11 {
      %c0_10 = arith.constant 0 : index
      %c0_11 = arith.constant 0 : index
      %12 = vector.load %arg6[%c0_10, %c0_11] : memref<4x128xf32, #tpu.memory_space<vmem>>, vector<4x128xf32>
      %13 = arith.truncf %12 : vector<4x128xf32> to vector<4x128xbf16>
      %c0_12 = arith.constant 0 : index
      %c0_13 = arith.constant 0 : index
      %14 = vector.load %arg3[%c0_12, %c0_13] : memref<128x128xbf16, #tpu.memory_space<vmem>>, vector<128x128xbf16>
      %cst_14 = arith.constant dense<0.000000e+00> : vector<4x128xf32>
      %15 = tpu.matmul %13, %14, %cst_14 {dimension_numbers = #tpu.dot_dimension_numbers<[1], [0], [0], [1], [0, 0, 1, 1], [], []>} : vector<4x128xbf16>, vector<128x128xbf16>, vector<4x128xf32> -> vector<4x128xf32>
      %c0_15 = arith.constant 0 : index
      %c0_16 = arith.constant 0 : index
      %16 = vector.load %arg4[%c0_15, %c0_16] : memref<1x128xf32, #tpu.memory_space<vmem>>, vector<1x128xf32>
      %17 = vector.broadcast %16 : vector<1x128xf32> to vector<4x128xf32>
      %18 = arith.addf %15, %17 : vector<4x128xf32>
      %c0_17 = arith.constant 0 : index
      %c0_18 = arith.constant 0 : index
      %19 = vector.load %arg5[%c0_17, %c0_18] : memref<4x128xf32, #tpu.memory_space<vmem>>, vector<4x128xf32>
      tpu.vector_store %arg5[%c0_17, %c0_18], %18 {strides = array<i32>} : memref<4x128xf32, #tpu.memory_space<vmem>>, vector<4x128xf32>,
    } else {
    }
    return
  }
  func.func @transform_0(%arg0: i32) -> (i32, i32) {
    %c0_i32 = arith.constant 0 : i32
    %c0_i32_0 = arith.constant 0 : i32
    return %c0_i32, %arg0 : i32, i32
  }
  func.func @transform_1(%arg0: i32) -> (i32, i32) {
    %c0_i32 = arith.constant 0 : i32
    %c0_i32_0 = arith.constant 0 : i32
    return %arg0, %c0_i32 : i32, i32
  }
  func.func @transform_2(%arg0: i32) -> (i32, i32) {
    %c0_i32 = arith.constant 0 : i32
    %c0_i32_0 = arith.constant 0 : i32
    %c0_i32_1 = arith.constant 0 : i32
    return %c0_i32, %c0_i32_0 : i32, i32
  }
  func.func @transform_3(%arg0: i32) -> (i32, i32) {
    %c0_i32 = arith.constant 0 : i32
    %c0_i32_0 = arith.constant 0 : i32
    %c0_i32_1 = arith.constant 0 : i32
    return %c0_i32, %c0_i32_0 : i32, i32
  }
  func.func @transform_4(%arg0: i32) -> (i32, i32) {
    %c0_i32 = arith.constant 0 : i32
    %c0_i32_0 = arith.constant 0 : i32
    %c0_i32_1 = arith.constant 0 : i32
    return %c0_i32, %c0_i32_0 : i32, i32
  }
}

module attributes {stable_mosaic.version = 11 : i64} {
  func.func @decoder_kernel(%arg0: i32, %arg1: i32, %arg2: memref<128x128xbf16, #tpu.memory_space<vmem>>, %arg3: memref<128x128xbf16, #tpu.memory_space<vmem>>, %arg4: memref<128x128xbf16, #tpu.memory_space<vmem>>) attributes {dimension_semantics = [#tpu.dimension_semantics<parallel>, #tpu.dimension_semantics<parallel>], iteration_bounds = array<i64: 1, 1>, scalar_prefetch = 0 : i64, scratch_operands = 0 : i64, tpu.core_type = #tpu.core_type<tc>, window_params = [{transform_indices = @transform_0, window_bounds = array<i64: 128, 128>}, {transform_indices = @transform_1, window_bounds = array<i64: 128, 128>}, {transform_indices = @transform_2, window_bounds = array<i64: 128, 128>}]} {
    %c0 = arith.constant 0 : index
    %c0_0 = arith.constant 0 : index
    %0 = vector.load %arg2[%c0, %c0_0] : memref<128x128xbf16, #tpu.memory_space<vmem>>, vector<128x128xbf16>
    %c0_1 = arith.constant 0 : index
    %c0_2 = arith.constant 0 : index
    %1 = vector.load %arg3[%c0_1, %c0_2] : memref<128x128xbf16, #tpu.memory_space<vmem>>, vector<128x128xbf16>
    %cst = arith.constant dense<0.000000e+00> : vector<128x128xf32>
    %2 = tpu.matmul %0, %1, %cst {dimension_numbers = #tpu.dot_dimension_numbers<[1], [1], [0], [0], [0, 0, 1, 0], [], []>} : vector<128x128xbf16>, vector<128x128xbf16>, vector<128x128xf32> -> vector<128x128xf32>
    %3 = arith.negf %2 : vector<128x128xf32>
    %4 = math.exp %3 : vector<128x128xf32>
    %cst_3 = arith.constant 1.000000e+00 : f32
    %5 = vector.broadcast %cst_3 : f32 to vector<128x128xf32>
    %6 = arith.addf %5, %4 : vector<128x128xf32>
    %7 = arith.divf %5, %6 : vector<128x128xf32>
    %8 = arith.truncf %7 : vector<128x128xf32> to vector<128x128xbf16>
    %c0_4 = arith.constant 0 : index
    %c0_5 = arith.constant 0 : index
    %9 = vector.load %arg4[%c0_4, %c0_5] : memref<128x128xbf16, #tpu.memory_space<vmem>>, vector<128x128xbf16>
    tpu.vector_store %arg4[%c0_4, %c0_5], %8 {strides = array<i32>} : memref<128x128xbf16, #tpu.memory_space<vmem>>, vector<128x128xbf16>,
    return
  }
  func.func @transform_0(%arg0: i32, %arg1: i32) -> (i32, i32) {
    %c0_i32 = arith.constant 0 : i32
    %c0_i32_0 = arith.constant 0 : i32
    return %arg0, %c0_i32 : i32, i32
  }
  func.func @transform_1(%arg0: i32, %arg1: i32) -> (i32, i32) {
    %c0_i32 = arith.constant 0 : i32
    %c0_i32_0 = arith.constant 0 : i32
    return %arg1, %c0_i32 : i32, i32
  }
  func.func @transform_2(%arg0: i32, %arg1: i32) -> (i32, i32) {
    %c0_i32 = arith.constant 0 : i32
    return %arg0, %arg1 : i32, i32
  }
}

</mosaic_0001>

<bundles_post_ra>
// kernel: joint_forward.6
= control target key start
LH: loop header
LB: loop body
LE: loop exit
PB: predicated region body
PF: predicated region fallthrough
CT: control target
= control target key end

     0   :  { %v379_v1 = vmov 0.0   ;;  %vm380_vm0 = vmmov 0   ;;  %s464_s0 = inlined_call_operand.vmem [shape: bf16[4,128], index: 0, kind: input, shape index: {}]   ;;  %s465_s1 = inlined_call_operand.vmem [shape: bf16[128,128], index: 1, kind: input, shape index: {}]   ;;  %s466_s2 = inlined_call_operand.vmem [shape: bf16[128,128], index: 2, kind: input, shape index: {}]   ;;  %s467_s3 = inlined_call_operand.vmem [shape: f32[1,128], index: 3, kind: input, shape index: {}]   ;;  %s468_s4 = inlined_call_operand.hbm [shape: f32[4,128], index: 4, kind: output, shape index: {}]  }
   0x1   :  { %v341_v0 = vld [vmem:[%s465_s1 + $0x38] sm:$0xff]   ;;  %298 = vmatprep.subr.bf16.mxu0 %v379_v1  ;;  %23 = vst [vmem:[#allocation2] sm:$0xf] %v379_v1  ;;  %318 = vmatprep.subr.bf16.mxu1 %v379_v1  ;;  %v342_v2 = vld [vmem:[%s465_s1 + $0x30] sm:$0xff]   ;;  %v343_v3 = vld [vmem:[%s465_s1 + $0x28] sm:$0xff]  }
   0x2   :  { %299 = vmatpush3.bf16.msra.mxu0 %v341_v0  ;;  %314 = vmatprep.mubr.msk.bf16.mxu0 %vm380_vm0, %v379_v1  ;;  %v349_v4 = vld [vmem:[%s466_s2 + $0x38] sm:$0xff]   ;;  %v344_v5 = vld [vmem:[%s465_s1 + $0x20] sm:$0xff]   ;;  %v350_v6 = vld [vmem:[%s466_s2 + $0x30] sm:$0xff]  }
   0x3   :  { %300 = vmatprep.subr.bf16.mxu0 %v379_v1  ;;  %334 = vmatprep.mubr.msk.bf16.mxu1 %vm380_vm0, %v379_v1  ;;  %v345_v7 = vld [vmem:[%s465_s1 + $0x18] sm:$0xff]   ;;  %v351_v8 = vld [vmem:[%s466_s2 + $0x28] sm:$0xff]  }
   0x4   :  { %319 = vmatpush3.bf16.msra.mxu1 %v349_v4 }
   0x5   :  { %320 = vmatprep.subr.bf16.mxu1 %v379_v1 }
   0x6   :  { %301 = vmatpush3.bf16.msra.mxu0 %v342_v2 }
   0x7   :  { %302 = vmatprep.subr.bf16.mxu0 %v379_v1 }
   0x8   :  { %321 = vmatpush3.bf16.msra.mxu1 %v350_v6 }
   0xa   :  { %303 = vmatpush3.bf16.msra.mxu0 %v343_v3 }
   0xb   :  { %304 = vmatprep.subr.bf16.mxu0 %v379_v1 }
   0xe   :  { %305 = vmatpush3.bf16.msra.mxu0 %v344_v5 }
   0xf   :  { %306 = vmatprep.subr.bf16.mxu0 %v379_v1 }
  0x10   :  { %9 = vsyncpa [#allocation4], 0  ;;  %322 = vmatprep.subr.bf16.mxu1 %v379_v1  ;;  %v346_v9 = vld [vmem:[%s465_s1 + $0x10] sm:$0xff]   ;;  %v352_v10 = vld [vmem:[%s466_s2 + $0x20] sm:$0xff]   ;;  %s381_s23 = smov [#allocation3]  }
  0x11   :  { %323 = vmatpush3.bf16.msra.mxu1 %v351_v8  ;;  %v347_v11 = vld [vmem:[%s465_s1 + $0x8] sm:$0xff]   ;;  %v353_v12 = vld [vmem:[%s466_s2 + $0x18] sm:$0xff]   ;;  %v348_v13 = vld [vmem:[%s465_s1] sm:$0xff]   ;;  %s255_s24 = sshll.u32 %s381_s23, 4  ;;  %s256_s24 = int_to_ptr.vmem [resolvable:$true] %s255_s24 }
  0x12   :  { %307 = vmatpush3.bf16.msra.mxu0 %v345_v7  ;;  %324 = vmatprep.subr.bf16.mxu1 %v379_v1  ;;  %v25_v14 = vld [vmem:[%s464_s0] sm:$0x3]  ;;  %v354_v15 = vld [vmem:[%s466_s2 + $0x10] sm:$0xff]   ;;  %v355_v16 = vld [vmem:[%s466_s2 + $0x8] sm:$0xff]   ;;  %p362_p1 = scmp.lt.s32.totalorder %s256_s24, %s256_s24 }
  0x13   :  { %308 = vmatprep.subr.bf16.mxu0 %v379_v1  ;;  %v356_v17 = vld [vmem:[%s466_s2] sm:$0xff]   ;;  %s357_s2 = scalar_lea.vmem %s256_s24, 64 }
  0x14   :  { %v24_v18 = vld [vmem:[#allocation2] sm:$0xf]  ;;  %p358_p0 = scmp.ne.s32.totalorder %s256_s24, %s357_s2  ;;  %p363_p2 = scmp.lt.s32.totalorder %s357_s2, %s357_s2 }
  0x15   :  { %325 = vmatpush3.bf16.msra.mxu1 %v352_v10  ;;  %v271_v26 = vld [vmem:[%s467_s3] ss:$0 sm:$0xff] }
  0x16   :  { %309 = vmatpush3.bf16.msra.mxu0 %v346_v9  ;;  %326 = vmatprep.subr.bf16.mxu1 %v379_v1  ;;  %p364_p3 = por %p363_p2, %p362_p1 }
  0x17   :  { %310 = vmatprep.subr.bf16.mxu0 %v379_v1 }
  0x18   :  { %p365_p4 = pnand %p364_p3, %p358_p0 }
  0x19   :  { %327 = vmatpush3.bf16.msra.mxu1 %v353_v12 }
  0x1a   :  { %311 = vmatpush3.bf16.msra.mxu0 %v347_v11  ;;  %328 = vmatprep.subr.bf16.mxu1 %v379_v1 }
  0x1b   :  { %312 = vmatprep.subr.bf16.mxu0 %v379_v1 }
  0x1d   :  { %329 = vmatpush3.bf16.msra.mxu1 %v354_v15 }
  0x1e   :  { %313 = vmatpush3.bf16.msra.mxu0 %v348_v13  ;;  %330 = vmatprep.subr.bf16.mxu1 %v379_v1 }
  0x21   :  { %315 = vmatmul.mubr.bf16.vlgmr.msra.gmra.mxu0 %v25_v14  ;;  %331 = vmatpush3.bf16.msra.mxu1 %v355_v16 }
  0x22   :  { %332 = vmatprep.subr.bf16.mxu1 %v379_v1 }
  0x25   :  { %333 = vmatpush3.bf16.msra.mxu1 %v356_v17 }
  0xe1   :  { %v124_v19 = vpop.f32.mrf.mxu0 }
  0xe2   :  { %v130_v20 = vadd.f32 %v124_v19, %v24_v18 }
  0xe3   :  { %v316_v21 = vpop.f32.mrf.mxu0 }
  0xe4   :  { %131 = vst [vmem:[#allocation2] sm:$0xf] %v130_v20 }
  0xe5   :  { %v127_v22 = vpop.f32.mrf.mxu0 }
  0xe7   :  { %v317_v23 = vpop.f32.mrf.mxu0 }
  0xeb   :  { %v135_v24 = vld [vmem:[#allocation2] sm:$0xf] }
  0xec   :  { %v136_v25 = vpack.c.bf16 %v135_v24, %v135_v24 }
  0xee   :  { %335 = vmatmul.mubr.bf16.vlgmr.msra.gmra.mxu1 %v136_v25 }
 0x1ae   :  { %v242_v27 = vpop.f32.mrf.mxu1 }
 0x1af   :  { %v243_v28 = vadd.f32 %v271_v26, %v242_v27 }
 0x1b0   :  { %v336_v29 = vpop.f32.mrf.mxu1 }
 0x1b1   :  { %248 = vst [vmem:[#allocation3] sm:$0xf] %v243_v28 }
 0x1b2   :  { %v245_v30 = vpop.f32.mrf.mxu1 }
 0x1b3   :  { %368 = shalt.err (!%p365_p4)
}
 0x1b4   :  { %258 = dma.vmem_to_hbm [thread:$0]  %s256_s24, 64, %s468_s4, [#allocation4]   ;;  %v337_v31 = vpop.f32.mrf.mxu1 }
 0x1b5   :  { %377 = dma.done.wait [#allocation4], 64  }
 0x1b6   :  { %378 = vsyncadd [#allocation4], 4294967232 }
 0x1b7   :  { %262 = vsyncpa [#allocation4], 1 }

// kernel: joint_forward.4
= control target key start
LH: loop header
LB: loop body
LE: loop exit
PB: predicated region body
PF: predicated region fallthrough
CT: control target
= control target key end

     0   :  { %s721_s1 = inlined_call_operand.vmem [shape: bf16[128,128], index: 1, kind: input, shape index: {}]   ;;  %s722_s0 = inlined_call_operand.vmem [shape: bf16[128,128], index: 0, kind: input, shape index: {}]   ;;  %s723_s2 = inlined_call_operand.vmem [shape: f32[1,128], index: 2, kind: input, shape index: {}]   ;;  %s724_s3 = inlined_call_operand.vmem [shape: bf16[128,128], index: 3, kind: output, shape index: {}]  }
   0x1   :  { %v610_v0 = vld [vmem:[%s721_s1 + $0x38] sm:$0xff]   ;;  %v611_v1 = vld [vmem:[%s721_s1 + $0x30] sm:$0xff]   ;;  %v612_v2 = vld [vmem:[%s721_s1 + $0x28] sm:$0xff]  }
   0x2   :  { %562 = vmatprep.subr.bf16.mxu0 %v610_v0  ;;  %594 = vmatprep.subr.bf16.mxu1 %v610_v0  ;;  %v613_v3 = vld [vmem:[%s721_s1 + $0x20] sm:$0xff]   ;;  %v614_v6 = vld [vmem:[%s721_s1 + $0x18] sm:$0xff]   ;;  %v615_v7 = vld [vmem:[%s721_s1 + $0x10] sm:$0xff]  }
   0x3   :  { %563 = vmatpush3.bf16.msra.mxu0 %v610_v0  ;;  %602 = vmatpush3.bf16.msra.mxu1 %v610_v0  ;;  %v618_v4 = vld [vmem:[%s722_s0] sm:$0xff]   ;;  %v616_v8 = vld [vmem:[%s721_s1 + $0x8] sm:$0xff]   ;;  %v622_v12 = vld [vmem:[%s722_s0 + $0x10] sm:$0xff]  }
   0x4   :  { %564 = vmatprep.subr.bf16.mxu0 %v611_v1  ;;  %595 = vmatprep.subr.bf16.mxu1 %v611_v1  ;;  %v619_v5 = vld [vmem:[%s722_s0 + $0x20] sm:$0xff]   ;;  %v620_v10 = vld [vmem:[%s722_s0 + $0x8] sm:$0xff]   ;;  %v623_v13 = vld [vmem:[%s722_s0 + $0x30] sm:$0xff]  }
   0x5   :  { %578 = vmatprep.mubr.bf16.mxu0 %v618_v4  ;;  %586 = vmatprep.mubr.bf16.mxu1 %v619_v5  ;;  %v617_v9 = vld [vmem:[%s721_s1] sm:$0xff]   ;;  %v621_v11 = vld [vmem:[%s722_s0 + $0x28] sm:$0xff]   ;;  %v624_v14 = vld [vmem:[%s722_s0 + $0x18] sm:$0xff]  }
   0x6   :  { %v625_v15 = vld [vmem:[%s722_s0 + $0x38] sm:$0xff]   ;;  %v466_v16 = vld [vmem:[%s723_s2] ss:$0 sm:$0xff] }
   0x7   :  { %565 = vmatpush3.bf16.msra.mxu0 %v611_v1  ;;  %603 = vmatpush3.bf16.msra.mxu1 %v611_v1 }
   0x8   :  { %566 = vmatprep.subr.bf16.mxu0 %v612_v2  ;;  %596 = vmatprep.subr.bf16.mxu1 %v612_v2 }
   0xb   :  { %567 = vmatpush3.bf16.msra.mxu0 %v612_v2  ;;  %604 = vmatpush3.bf16.msra.mxu1 %v612_v2 }
   0xc   :  { %568 = vmatprep.subr.bf16.mxu0 %v613_v3  ;;  %597 = vmatprep.subr.bf16.mxu1 %v613_v3 }
   0xf   :  { %569 = vmatpush3.bf16.msra.mxu0 %v613_v3  ;;  %605 = vmatpush3.bf16.msra.mxu1 %v613_v3 }
  0x10   :  { %570 = vmatprep.subr.bf16.mxu0 %v614_v6  ;;  %598 = vmatprep.subr.bf16.mxu1 %v614_v6 }
  0x13   :  { %571 = vmatpush3.bf16.msra.mxu0 %v614_v6  ;;  %606 = vmatpush3.bf16.msra.mxu1 %v614_v6 }
  0x14   :  { %572 = vmatprep.subr.bf16.mxu0 %v615_v7  ;;  %599 = vmatprep.subr.bf16.mxu1 %v615_v7 }
  0x17   :  { %573 = vmatpush3.bf16.msra.mxu0 %v615_v7  ;;  %607 = vmatpush3.bf16.msra.mxu1 %v615_v7 }
  0x18   :  { %574 = vmatprep.subr.bf16.mxu0 %v616_v8  ;;  %600 = vmatprep.subr.bf16.mxu1 %v616_v8 }
  0x1b   :  { %575 = vmatpush3.bf16.msra.mxu0 %v616_v8  ;;  %608 = vmatpush3.bf16.msra.mxu1 %v616_v8 }
  0x1c   :  { %576 = vmatprep.subr.bf16.mxu0 %v617_v9  ;;  %601 = vmatprep.subr.bf16.mxu1 %v617_v9 }
  0x1f   :  { %577 = vmatpush3.bf16.msra.mxu0 %v617_v9  ;;  %609 = vmatpush3.bf16.msra.mxu1 %v617_v9 }
  0x22   :  { %579 = vmatmul.mubr.bf16.vlgmr.msra.gmra.mxu0 %v620_v10  ;;  %587 = vmatmul.mubr.bf16.vlgmr.msra.gmra.mxu1 %v621_v11 }
  0x23   :  { %582 = vmatprep.mubr.bf16.mxu0 %v622_v12  ;;  %590 = vmatprep.mubr.bf16.mxu1 %v623_v13 }
  0x2a   :  { %583 = vmatmul.mubr.bf16.gmra.mxu0 %v624_v14  ;;  %591 = vmatmul.mubr.bf16.gmra.mxu1 %v625_v15 }
  0xe2   :  { %v580_v17 = vpop.f32.mrf.mxu0  ;;  %v588_v18 = vpop.f32.mrf.mxu1 }
  0xe3   :  { %v336_v19 = vadd.f32 %v580_v17, %v466_v16  ;;  %v344_v20 = vadd.f32 %v588_v18, %v466_v16 }
  0xe4   :  { %v213_v21 = vpop.f32.mrf.mxu0  ;;  %v245_v22 = vpop.f32.mrf.mxu1 }
  0xe5   :  { %v334_v23 = vadd.f32 %v466_v16, %v213_v21  ;;  %v342_v24 = vadd.f32 %v466_v16, %v245_v22  ;;  %v352_v29 = vmax.f32 %v336_v19, 0.0  ;;  %v360_v30 = vmax.f32 %v344_v20, 0.0 }
  0xe6   :  { %v581_v25 = vpop.f32.mrf.mxu0  ;;  %v589_v26 = vpop.f32.mrf.mxu1 }
  0xe7   :  { %v337_v27 = vadd.f32 %v581_v25, %v466_v16  ;;  %v345_v28 = vadd.f32 %v589_v26, %v466_v16  ;;  %v350_v37 = vmax.f32 %v334_v23, 0.0  ;;  %v358_v38 = vmax.f32 %v342_v24, 0.0 }
  0xe8   :  { %v216_v31 = vpop.f32.mrf.mxu0  ;;  %v248_v32 = vpop.f32.mrf.mxu1 }
  0xe9   :  { %v353_v33 = vmax.f32 %v337_v27, 0.0  ;;  %v361_v34 = vmax.f32 %v345_v28, 0.0  ;;  %v335_v35 = vadd.f32 %v466_v16, %v216_v31  ;;  %v343_v36 = vadd.f32 %v466_v16, %v248_v32 }
  0xea   :  { %v584_v39 = vpop.f32.mrf.mxu0  ;;  %v592_v40 = vpop.f32.mrf.mxu1 }
  0xeb   :  { %v507_v41 = vpack.c.bf16 %v353_v33, %v352_v29  ;;  %v527_v42 = vpack.c.bf16 %v361_v34, %v360_v30  ;;  %v351_v43 = vmax.f32 %v335_v35, 0.0  ;;  %v359_v44 = vmax.f32 %v343_v36, 0.0 }
  0xec   :  { %v340_v45 = vadd.f32 %v584_v39, %v466_v16  ;;  %v348_v46 = vadd.f32 %v592_v40, %v466_v16  ;;  %v229_v47 = vpop.f32.mrf.mxu0  ;;  %v261_v48 = vpop.f32.mrf.mxu1 }
  0xed   :  { %539 = vst [vmem:[%s724_s3 + $0x8] sm:$0xff] %v507_v41   ;;  %543 = vst [vmem:[%s724_s3 + $0x28] sm:$0xff] %v527_v42   ;;  %v502_v49 = vpack.c.bf16 %v351_v43, %v350_v37  ;;  %v522_v50 = vpack.c.bf16 %v359_v44, %v358_v38  ;;  %v338_v51 = vadd.f32 %v466_v16, %v229_v47 }
  0xee   :  { %v346_v52 = vadd.f32 %v466_v16, %v261_v48  ;;  %v585_v53 = vpop.f32.mrf.mxu0  ;;  %v593_v54 = vpop.f32.mrf.mxu1  ;;  %v356_v57 = vmax.f32 %v340_v45, 0.0  ;;  %v364_v58 = vmax.f32 %v348_v46, 0.0 }
  0xef   :  { %503 = vst [vmem:[%s724_s3] sm:$0xff] %v502_v49   ;;  %542 = vst [vmem:[%s724_s3 + $0x20] sm:$0xff] %v522_v50   ;;  %v341_v55 = vadd.f32 %v585_v53, %v466_v16  ;;  %v349_v56 = vadd.f32 %v593_v54, %v466_v16  ;;  %v354_v1 = vmax.f32 %v338_v51, 0.0 }
  0xf0   :  { %v232_v59 = vpop.f32.mrf.mxu0  ;;  %v264_v60 = vpop.f32.mrf.mxu1  ;;  %v362_v2 = vmax.f32 %v346_v52, 0.0 }
  0xf1   :  { %v357_v61 = vmax.f32 %v341_v55, 0.0  ;;  %v365_v62 = vmax.f32 %v349_v56, 0.0  ;;  %v339_v63 = vadd.f32 %v466_v16, %v232_v59  ;;  %v347_v0 = vadd.f32 %v466_v16, %v264_v60 }
  0xf3   :  { %v517_v3 = vpack.c.bf16 %v357_v61, %v356_v57  ;;  %v537_v4 = vpack.c.bf16 %v365_v62, %v364_v58  ;;  %v355_v5 = vmax.f32 %v339_v63, 0.0  ;;  %v363_v6 = vmax.f32 %v347_v0, 0.0 }
  0xf5   :  { %541 = vst [vmem:[%s724_s3 + $0x18] sm:$0xff] %v517_v3   ;;  %545 = vst [vmem:[%s724_s3 + $0x38] sm:$0xff] %v537_v4   ;;  %v512_v7 = vpack.c.bf16 %v355_v5, %v354_v1  ;;  %v532_v8 = vpack.c.bf16 %v363_v6, %v362_v2 }
  0xf7   :  { %540 = vst [vmem:[%s724_s3 + $0x10] sm:$0xff] %v512_v7   ;;  %544 = vst [vmem:[%s724_s3 + $0x30] sm:$0xff] %v532_v8  }

// kernel: joint_forward.5
= control target key start
LH: loop header
LB: loop body
LE: loop exit
PB: predicated region body
PF: predicated region fallthrough
CT: control target
= control target key end

     0   :  { %s705_s1 = inlined_call_operand.vmem [shape: bf16[128,128], index: 1, kind: input, shape index: {}]   ;;  %s706_s0 = inlined_call_operand.vmem [shape: bf16[128,128], index: 0, kind: input, shape index: {}]   ;;  %s707_s2 = inlined_call_operand.vmem [shape: f32[1,128], index: 2, kind: input, shape index: {}]   ;;  %s708_s3 = inlined_call_operand.vmem [shape: bf16[128,128], index: 3, kind: output, shape index: {}]  }
   0x1   :  { %v594_v0 = vld [vmem:[%s705_s1 + $0x38] sm:$0xff]   ;;  %v595_v1 = vld [vmem:[%s705_s1 + $0x30] sm:$0xff]   ;;  %v596_v2 = vld [vmem:[%s705_s1 + $0x28] sm:$0xff]  }
   0x2   :  { %546 = vmatprep.subr.bf16.mxu0 %v594_v0  ;;  %578 = vmatprep.subr.bf16.mxu1 %v594_v0  ;;  %v597_v3 = vld [vmem:[%s705_s1 + $0x20] sm:$0xff]   ;;  %v598_v6 = vld [vmem:[%s705_s1 + $0x18] sm:$0xff]   ;;  %v599_v7 = vld [vmem:[%s705_s1 + $0x10] sm:$0xff]  }
   0x3   :  { %547 = vmatpush3.bf16.msra.mxu0 %v594_v0  ;;  %586 = vmatpush3.bf16.msra.mxu1 %v594_v0  ;;  %v602_v4 = vld [vmem:[%s706_s0] sm:$0xff]   ;;  %v600_v8 = vld [vmem:[%s705_s1 + $0x8] sm:$0xff]   ;;  %v606_v12 = vld [vmem:[%s706_s0 + $0x10] sm:$0xff]  }
   0x4   :  { %548 = vmatprep.subr.bf16.mxu0 %v595_v1  ;;  %579 = vmatprep.subr.bf16.mxu1 %v595_v1  ;;  %v603_v5 = vld [vmem:[%s706_s0 + $0x20] sm:$0xff]   ;;  %v604_v10 = vld [vmem:[%s706_s0 + $0x8] sm:$0xff]   ;;  %v607_v13 = vld [vmem:[%s706_s0 + $0x30] sm:$0xff]  }
   0x5   :  { %562 = vmatprep.mubr.bf16.mxu0 %v602_v4  ;;  %570 = vmatprep.mubr.bf16.mxu1 %v603_v5  ;;  %v601_v9 = vld [vmem:[%s705_s1] sm:$0xff]   ;;  %v605_v11 = vld [vmem:[%s706_s0 + $0x28] sm:$0xff]   ;;  %v608_v14 = vld [vmem:[%s706_s0 + $0x18] sm:$0xff]  }
   0x6   :  { %v609_v15 = vld [vmem:[%s706_s0 + $0x38] sm:$0xff]   ;;  %v450_v18 = vld [vmem:[%s707_s2] ss:$0 sm:$0xff] }
   0x7   :  { %549 = vmatpush3.bf16.msra.mxu0 %v595_v1  ;;  %587 = vmatpush3.bf16.msra.mxu1 %v595_v1 }
   0x8   :  { %550 = vmatprep.subr.bf16.mxu0 %v596_v2  ;;  %580 = vmatprep.subr.bf16.mxu1 %v596_v2 }
   0xb   :  { %551 = vmatpush3.bf16.msra.mxu0 %v596_v2  ;;  %588 = vmatpush3.bf16.msra.mxu1 %v596_v2 }
   0xc   :  { %552 = vmatprep.subr.bf16.mxu0 %v597_v3  ;;  %581 = vmatprep.subr.bf16.mxu1 %v597_v3 }
   0xf   :  { %553 = vmatpush3.bf16.msra.mxu0 %v597_v3  ;;  %589 = vmatpush3.bf16.msra.mxu1 %v597_v3 }
  0x10   :  { %554 = vmatprep.subr.bf16.mxu0 %v598_v6  ;;  %582 = vmatprep.subr.bf16.mxu1 %v598_v6 }
  0x13   :  { %555 = vmatpush3.bf16.msra.mxu0 %v598_v6  ;;  %590 = vmatpush3.bf16.msra.mxu1 %v598_v6 }
  0x14   :  { %556 = vmatprep.subr.bf16.mxu0 %v599_v7  ;;  %583 = vmatprep.subr.bf16.mxu1 %v599_v7 }
  0x17   :  { %557 = vmatpush3.bf16.msra.mxu0 %v599_v7  ;;  %591 = vmatpush3.bf16.msra.mxu1 %v599_v7 }
  0x18   :  { %558 = vmatprep.subr.bf16.mxu0 %v600_v8  ;;  %584 = vmatprep.subr.bf16.mxu1 %v600_v8 }
  0x1b   :  { %559 = vmatpush3.bf16.msra.mxu0 %v600_v8  ;;  %592 = vmatpush3.bf16.msra.mxu1 %v600_v8 }
  0x1c   :  { %560 = vmatprep.subr.bf16.mxu0 %v601_v9  ;;  %585 = vmatprep.subr.bf16.mxu1 %v601_v9 }
  0x1f   :  { %561 = vmatpush3.bf16.msra.mxu0 %v601_v9  ;;  %593 = vmatpush3.bf16.msra.mxu1 %v601_v9 }
  0x22   :  { %563 = vmatmul.mubr.bf16.vlgmr.msra.gmra.mxu0 %v604_v10  ;;  %571 = vmatmul.mubr.bf16.vlgmr.msra.gmra.mxu1 %v605_v11 }
  0x23   :  { %566 = vmatprep.mubr.bf16.mxu0 %v606_v12  ;;  %574 = vmatprep.mubr.bf16.mxu1 %v607_v13 }
  0x2a   :  { %567 = vmatmul.mubr.bf16.gmra.mxu0 %v608_v14  ;;  %575 = vmatmul.mubr.bf16.gmra.mxu1 %v609_v15 }
  0xe2   :  { %v564_v16 = vpop.f32.mrf.mxu0  ;;  %v572_v17 = vpop.f32.mrf.mxu1 }
  0xe3   :  { %v336_v23 = vadd.f32 %v564_v16, %v450_v18  ;;  %v344_v24 = vadd.f32 %v572_v17, %v450_v18 }
  0xe4   :  { %v213_v19 = vpop.f32.mrf.mxu0  ;;  %v245_v20 = vpop.f32.mrf.mxu1 }
  0xe5   :  { %v334_v27 = vadd.f32 %v450_v18, %v213_v19  ;;  %v342_v28 = vadd.f32 %v450_v18, %v245_v20 }
  0xe6   :  { %v565_v21 = vpop.f32.mrf.mxu0  ;;  %v573_v22 = vpop.f32.mrf.mxu1 }
  0xe7   :  { %v337_v25 = vadd.f32 %v565_v21, %v450_v18  ;;  %v345_v26 = vadd.f32 %v573_v22, %v450_v18 }
  0xe8   :  { %v216_v29 = vpop.f32.mrf.mxu0  ;;  %v248_v30 = vpop.f32.mrf.mxu1 }
  0xe9   :  { %v491_v31 = vpack.c.bf16 %v337_v25, %v336_v23  ;;  %v511_v32 = vpack.c.bf16 %v345_v26, %v344_v24  ;;  %v335_v33 = vadd.f32 %v450_v18, %v216_v29  ;;  %v343_v34 = vadd.f32 %v450_v18, %v248_v30 }
  0xea   :  { %v568_v35 = vpop.f32.mrf.mxu0  ;;  %v576_v36 = vpop.f32.mrf.mxu1 }
  0xeb   :  { %523 = vst [vmem:[%s708_s3 + $0x8] sm:$0xff] %v491_v31   ;;  %527 = vst [vmem:[%s708_s3 + $0x28] sm:$0xff] %v511_v32   ;;  %v486_v37 = vpack.c.bf16 %v335_v33, %v334_v27  ;;  %v506_v38 = vpack.c.bf16 %v343_v34, %v342_v28  ;;  %v340_v43 = vadd.f32 %v568_v35, %v450_v18 }
  0xec   :  { %v229_v39 = vpop.f32.mrf.mxu0  ;;  %v261_v40 = vpop.f32.mrf.mxu1  ;;  %v348_v44 = vadd.f32 %v576_v36, %v450_v18 }
  0xed   :  { %487 = vst [vmem:[%s708_s3] sm:$0xff] %v486_v37   ;;  %526 = vst [vmem:[%s708_s3 + $0x20] sm:$0xff] %v506_v38   ;;  %v338_v47 = vadd.f32 %v450_v18, %v229_v39  ;;  %v346_v48 = vadd.f32 %v450_v18, %v261_v40 }
  0xee   :  { %v569_v41 = vpop.f32.mrf.mxu0  ;;  %v577_v42 = vpop.f32.mrf.mxu1 }
  0xef   :  { %v341_v45 = vadd.f32 %v569_v41, %v450_v18  ;;  %v349_v46 = vadd.f32 %v577_v42, %v450_v18 }
  0xf0   :  { %v232_v49 = vpop.f32.mrf.mxu0  ;;  %v264_v50 = vpop.f32.mrf.mxu1 }
  0xf1   :  { %v501_v51 = vpack.c.bf16 %v341_v45, %v340_v43  ;;  %v521_v52 = vpack.c.bf16 %v349_v46, %v348_v44  ;;  %v339_v53 = vadd.f32 %v450_v18, %v232_v49  ;;  %v347_v54 = vadd.f32 %v450_v18, %v264_v50 }
  0xf3   :  { %525 = vst [vmem:[%s708_s3 + $0x18] sm:$0xff] %v501_v51   ;;  %529 = vst [vmem:[%s708_s3 + $0x38] sm:$0xff] %v521_v52   ;;  %v496_v55 = vpack.c.bf16 %v339_v53, %v338_v47  ;;  %v516_v56 = vpack.c.bf16 %v347_v54, %v346_v48 }
  0xf5   :  { %524 = vst [vmem:[%s708_s3 + $0x10] sm:$0xff] %v496_v55   ;;  %528 = vst [vmem:[%s708_s3 + $0x30] sm:$0xff] %v516_v56  }

// kernel: joint_forward.7
= control target key start
LH: loop header
LB: loop body
LE: loop exit
PB: predicated region body
PF: predicated region fallthrough
CT: control target
= control target key end

     0   :  { %s759_s1 = inlined_call_operand.vmem [shape: bf16[128,128], index: 1, kind: input, shape index: {}, may-alias: {0,1}]   ;;  %s760_s0 = inlined_call_operand.vmem [shape: bf16[128,128], index: 0, kind: input, shape index: {}, may-alias: {0,1}]   ;;  %s761_s2 = inlined_call_operand.vmem [shape: bf16[128,128], index: 2, kind: output, shape index: {}]  }
   0x1   :  { %v592_v0 = vld [vmem:[%s759_s1 + $0x38] sm:$0xff]   ;;  %v593_v1 = vld [vmem:[%s759_s1 + $0x30] sm:$0xff]   ;;  %v594_v2 = vld [vmem:[%s759_s1 + $0x28] sm:$0xff]  }
   0x2   :  { %544 = vmatprep.subr.bf16.mxu0 %v592_v0  ;;  %576 = vmatprep.subr.bf16.mxu1 %v592_v0  ;;  %v600_v3 = vld [vmem:[%s760_s0] sm:$0xff]   ;;  %v596_v6 = vld [vmem:[%s759_s1 + $0x18] sm:$0xff]   ;;  %v597_v7 = vld [vmem:[%s759_s1 + $0x10] sm:$0xff]  }
   0x3   :  { %545 = vmatpush3.bf16.xpose.msra.mxu0 %v592_v0  ;;  %584 = vmatpush3.bf16.xpose.msra.mxu1 %v592_v0  ;;  %v601_v4 = vld [vmem:[%s760_s0 + $0x20] sm:$0xff]   ;;  %v598_v8 = vld [vmem:[%s759_s1 + $0x8] sm:$0xff]   ;;  %v604_v12 = vld [vmem:[%s760_s0 + $0x10] sm:$0xff]  }
   0x4   :  { %546 = vmatprep.subr.bf16.mxu0 %v593_v1  ;;  %577 = vmatprep.subr.bf16.mxu1 %v593_v1  ;;  %v595_v5 = vld [vmem:[%s759_s1 + $0x20] sm:$0xff]   ;;  %v602_v10 = vld [vmem:[%s760_s0 + $0x8] sm:$0xff]   ;;  %v605_v13 = vld [vmem:[%s760_s0 + $0x30] sm:$0xff]  }
   0x5   :  { %560 = vmatprep.mubr.bf16.mxu0 %v600_v3  ;;  %568 = vmatprep.mubr.bf16.mxu1 %v601_v4  ;;  %v599_v9 = vld [vmem:[%s759_s1] sm:$0xff]   ;;  %v603_v11 = vld [vmem:[%s760_s0 + $0x28] sm:$0xff]   ;;  %v606_v14 = vld [vmem:[%s760_s0 + $0x18] sm:$0xff]  }
   0x6   :  { %v607_v15 = vld [vmem:[%s760_s0 + $0x38] sm:$0xff]  }
   0xb   :  { %547 = vmatpush3.bf16.xpose.msra.mxu0 %v593_v1  ;;  %585 = vmatpush3.bf16.xpose.msra.mxu1 %v593_v1 }
   0xc   :  { %548 = vmatprep.subr.bf16.mxu0 %v594_v2  ;;  %578 = vmatprep.subr.bf16.mxu1 %v594_v2 }
  0x13   :  { %549 = vmatpush3.bf16.xpose.msra.mxu0 %v594_v2  ;;  %586 = vmatpush3.bf16.xpose.msra.mxu1 %v594_v2 }
  0x14   :  { %550 = vmatprep.subr.bf16.mxu0 %v595_v5  ;;  %579 = vmatprep.subr.bf16.mxu1 %v595_v5 }
  0x1b   :  { %551 = vmatpush3.bf16.xpose.msra.mxu0 %v595_v5  ;;  %587 = vmatpush3.bf16.xpose.msra.mxu1 %v595_v5 }
  0x1c   :  { %552 = vmatprep.subr.bf16.mxu0 %v596_v6  ;;  %580 = vmatprep.subr.bf16.mxu1 %v596_v6 }
  0x23   :  { %553 = vmatpush3.bf16.xpose.msra.mxu0 %v596_v6  ;;  %588 = vmatpush3.bf16.xpose.msra.mxu1 %v596_v6 }
  0x24   :  { %554 = vmatprep.subr.bf16.mxu0 %v597_v7  ;;  %581 = vmatprep.subr.bf16.mxu1 %v597_v7 }
  0x2b   :  { %555 = vmatpush3.bf16.xpose.msra.mxu0 %v597_v7  ;;  %589 = vmatpush3.bf16.xpose.msra.mxu1 %v597_v7 }
  0x2c   :  { %556 = vmatprep.subr.bf16.mxu0 %v598_v8  ;;  %582 = vmatprep.subr.bf16.mxu1 %v598_v8 }
  0x33   :  { %557 = vmatpush3.bf16.xpose.msra.mxu0 %v598_v8  ;;  %590 = vmatpush3.bf16.xpose.msra.mxu1 %v598_v8 }
  0x34   :  { %558 = vmatprep.subr.bf16.mxu0 %v599_v9  ;;  %583 = vmatprep.subr.bf16.mxu1 %v599_v9 }
  0x3b   :  { %559 = vmatpush3.bf16.xpose.msra.mxu0 %v599_v9  ;;  %591 = vmatpush3.bf16.xpose.msra.mxu1 %v599_v9 }
  0x42   :  { %561 = vmatmul.mubr.bf16.vlgmr.msra.gmra.mxu0 %v602_v10  ;;  %569 = vmatmul.mubr.bf16.vlgmr.msra.gmra.mxu1 %v603_v11 }
  0x43   :  { %564 = vmatprep.mubr.bf16.mxu0 %v604_v12  ;;  %572 = vmatprep.mubr.bf16.mxu1 %v605_v13 }
  0x4a   :  { %565 = vmatmul.mubr.bf16.gmra.mxu0 %v606_v14  ;;  %573 = vmatmul.mubr.bf16.gmra.mxu1 %v607_v15 }
 0x102   :  { %v562_v16 = vpop.f32.mrf.mxu0  ;;  %v570_v17 = vpop.f32.mrf.mxu1 }
 0x103   :  { %v435_v18 = vmul.f32 -1.442695, %v562_v16  ;;  %v443_v19 = vmul.f32 -1.442695, %v570_v17 }
 0x104   :  { %v174_v20 = vpop.f32.mrf.mxu0  ;;  %v206_v21 = vpop.f32.mrf.mxu1 }
 0x105   :  { %608 = vpow2.f32 %v435_v18  ;;  %v433_v22 = vmul.f32 -1.442695, %v174_v20  ;;  %v441_v23 = vmul.f32 -1.442695, %v206_v21 }
 0x106   :  { %610 = vpow2.f32 %v443_v19  ;;  %v563_v24 = vpop.f32.mrf.mxu0  ;;  %v571_v25 = vpop.f32.mrf.mxu1 }
 0x107   :  { %612 = vpow2.f32 %v433_v22  ;;  %v436_v26 = vmul.f32 -1.442695, %v563_v24  ;;  %v444_v27 = vmul.f32 -1.442695, %v571_v25 }
 0x108   :  { %614 = vpow2.f32 %v441_v23  ;;  %v177_v28 = vpop.f32.mrf.mxu0  ;;  %v209_v29 = vpop.f32.mrf.mxu1 }
 0x109   :  { %616 = vpow2.f32 %v436_v26  ;;  %v434_v30 = vmul.f32 -1.442695, %v177_v28  ;;  %v442_v31 = vmul.f32 -1.442695, %v209_v29 }
 0x10a   :  { %618 = vpow2.f32 %v444_v27  ;;  %v566_v32 = vpop.f32.mrf.mxu0  ;;  %v574_v33 = vpop.f32.mrf.mxu1 }
 0x10b   :  { %620 = vpow2.f32 %v434_v30  ;;  %v439_v34 = vmul.f32 -1.442695, %v566_v32  ;;  %v447_v35 = vmul.f32 -1.442695, %v574_v33 }
 0x10c   :  { %622 = vpow2.f32 %v442_v31  ;;  %v190_v36 = vpop.f32.mrf.mxu0  ;;  %v222_v37 = vpop.f32.mrf.mxu1 }
 0x10d   :  { %624 = vpow2.f32 %v439_v34  ;;  %v437_v38 = vmul.f32 -1.442695, %v190_v36  ;;  %v445_v39 = vmul.f32 -1.442695, %v222_v37 }
 0x10e   :  { %626 = vpow2.f32 %v447_v35  ;;  %v567_v40 = vpop.f32.mrf.mxu0  ;;  %v575_v41 = vpop.f32.mrf.mxu1 }
 0x10f   :  { %628 = vpow2.f32 %v437_v38  ;;  %v440_v42 = vmul.f32 -1.442695, %v567_v40  ;;  %v448_v43 = vmul.f32 -1.442695, %v575_v41 }
 0x110   :  { %630 = vpow2.f32 %v445_v39  ;;  %v193_v44 = vpop.f32.mrf.mxu0  ;;  %v225_v45 = vpop.f32.mrf.mxu1 }
 0x111   :  { %632 = vpow2.f32 %v440_v42  ;;  %v438_v46 = vmul.f32 -1.442695, %v193_v44  ;;  %v446_v47 = vmul.f32 -1.442695, %v225_v45 }
 0x112   :  { %v609_v48 = vpop.eup %608  ;;  %634 = vpow2.f32 %v448_v43 }
 0x113   :  { %v611_v49 = vpop.eup %610  ;;  %v287_v50 = vadd.f32 1.0, %v609_v48  ;;  %636 = vpow2.f32 %v438_v46 }
 0x114   :  { %v613_v51 = vpop.eup %612  ;;  %v295_v52 = vadd.f32 1.0, %v611_v49  ;;  %638 = vpow2.f32 %v446_v47 }
 0x115   :  { %v615_v53 = vpop.eup %614  ;;  %640 = vrcp.f32 %v287_v50  ;;  %v285_v54 = vadd.f32 1.0, %v613_v51 }
 0x116   :  { %v617_v55 = vpop.eup %616  ;;  %642 = vrcp.f32 %v295_v52  ;;  %v293_v56 = vadd.f32 1.0, %v615_v53 }
 0x117   :  { %v619_v57 = vpop.eup %618  ;;  %644 = vrcp.f32 %v285_v54  ;;  %v288_v58 = vadd.f32 1.0, %v617_v55 }
 0x118   :  { %v621_v59 = vpop.eup %620  ;;  %646 = vrcp.f32 %v293_v56  ;;  %v296_v60 = vadd.f32 1.0, %v619_v57 }
 0x119   :  { %v623_v61 = vpop.eup %622  ;;  %648 = vrcp.f32 %v288_v58  ;;  %v286_v62 = vadd.f32 1.0, %v621_v59 }
 0x11a   :  { %v625_v63 = vpop.eup %624  ;;  %650 = vrcp.f32 %v296_v60  ;;  %v294_v0 = vadd.f32 1.0, %v623_v61 }
 0x11b   :  { %v627_v1 = vpop.eup %626  ;;  %652 = vrcp.f32 %v286_v62  ;;  %v291_v2 = vadd.f32 1.0, %v625_v63 }
 0x11c   :  { %v629_v3 = vpop.eup %628  ;;  %654 = vrcp.f32 %v294_v0  ;;  %v299_v4 = vadd.f32 1.0, %v627_v1 }
 0x11d   :  { %v631_v5 = vpop.eup %630  ;;  %656 = vrcp.f32 %v291_v2  ;;  %v289_v6 = vadd.f32 1.0, %v629_v3 }
 0x11e   :  { %v633_v7 = vpop.eup %632  ;;  %658 = vrcp.f32 %v299_v4  ;;  %v297_v8 = vadd.f32 1.0, %v631_v5 }
 0x11f   :  { %v635_v9 = vpop.eup %634  ;;  %660 = vrcp.f32 %v289_v6  ;;  %v292_v10 = vadd.f32 1.0, %v633_v7 }
 0x120   :  { %v637_v11 = vpop.eup %636  ;;  %662 = vrcp.f32 %v297_v8  ;;  %v300_v12 = vadd.f32 1.0, %v635_v9 }
 0x121   :  { %v639_v13 = vpop.eup %638  ;;  %664 = vrcp.f32 %v292_v10  ;;  %v290_v14 = vadd.f32 1.0, %v637_v11 }
 0x122   :  { %v641_v15 = vpop.eup %640  ;;  %666 = vrcp.f32 %v300_v12  ;;  %v298_v16 = vadd.f32 1.0, %v639_v13 }
 0x123   :  { %v643_v17 = vpop.eup %642  ;;  %668 = vrcp.f32 %v290_v14 }
 0x124   :  { %v645_v18 = vpop.eup %644  ;;  %670 = vrcp.f32 %v298_v16 }
 0x125   :  { %v647_v19 = vpop.eup %646 }
 0x126   :  { %v649_v20 = vpop.eup %648 }
 0x127   :  { %v651_v21 = vpop.eup %650  ;;  %v489_v22 = vpack.c.bf16 %v649_v20, %v641_v15 }
 0x128   :  { %v653_v23 = vpop.eup %652  ;;  %v509_v24 = vpack.c.bf16 %v651_v21, %v643_v17 }
 0x129   :  { %v655_v25 = vpop.eup %654  ;;  %521 = vst [vmem:[%s761_s2 + $0x8] sm:$0xff] %v489_v22   ;;  %v484_v26 = vpack.c.bf16 %v653_v23, %v645_v18 }
 0x12a   :  { %v657_v27 = vpop.eup %656  ;;  %525 = vst [vmem:[%s761_s2 + $0x28] sm:$0xff] %v509_v24   ;;  %v504_v28 = vpack.c.bf16 %v655_v25, %v647_v19 }
 0x12b   :  { %v659_v29 = vpop.eup %658  ;;  %485 = vst [vmem:[%s761_s2] sm:$0xff] %v484_v26  }
 0x12c   :  { %v661_v30 = vpop.eup %660  ;;  %524 = vst [vmem:[%s761_s2 + $0x20] sm:$0xff] %v504_v28  }
 0x12d   :  { %v663_v31 = vpop.eup %662 }
 0x12e   :  { %v665_v32 = vpop.eup %664 }
 0x12f   :  { %v667_v33 = vpop.eup %666  ;;  %v499_v34 = vpack.c.bf16 %v665_v32, %v657_v27 }
 0x130   :  { %v669_v35 = vpop.eup %668  ;;  %v519_v36 = vpack.c.bf16 %v667_v33, %v659_v29 }
 0x131   :  { %v671_v37 = vpop.eup %670  ;;  %523 = vst [vmem:[%s761_s2 + $0x18] sm:$0xff] %v499_v34   ;;  %v494_v38 = vpack.c.bf16 %v669_v35, %v661_v30 }
 0x132   :  { %527 = vst [vmem:[%s761_s2 + $0x38] sm:$0xff] %v519_v36   ;;  %v514_v39 = vpack.c.bf16 %v671_v37, %v663_v31 }
 0x133   :  { %522 = vst [vmem:[%s761_s2 + $0x10] sm:$0xff] %v494_v38  }
 0x134   :  { %526 = vst [vmem:[%s761_s2 + $0x30] sm:$0xff] %v514_v39  }

</bundles_post_ra>
